<compile_context>
chip_gen: v7x
topology: tpu7x:2x2x1
jax: 0.10.0
libtpu: 0.0.40
codegen_flags: <defaults>
</compile_context>

<pallas_src>
import jax
import jax.numpy as jnp
from jax.experimental import pallas as pl
from jax.experimental.pallas import tpu as pltpu


def _round_up(x: int, m: int) -> int:
    return (x + m - 1) // m * m


# Probe once whether this JAX build supports single-buffering a BlockSpec via pipeline_mode.
try:
    pl.BlockSpec((8, 128), lambda i: (0, 0), pipeline_mode=pl.Buffered(1))
    _RESIDENT_KW = dict(pipeline_mode=pl.Buffered(1))   # constant index_map -> never re-fetched
    _WEIGHT_BUFS = 1
except Exception:                                        # older API: default double-buffering
    _RESIDENT_KW = {}
    _WEIGHT_BUFS = 2


def _vmem_capacity_bytes() -> int:
    try:
        return int(pltpu.get_tpu_info().vmem_capacity_bytes)
    except Exception:
        return 64 * 1024 * 1024   # conservative default (v7x per-TensorCore VMEM)


def _make_kernel(h_dtype):
    def kernel(x_ref, w1_ref, b1_ref, w2_ref, b2_ref, o_ref):
        # Fused fc1+fc2: the hidden activation never touches HBM; both matmuls accumulate in f32.
        x = x_ref[...]
        h = jnp.dot(x, w1_ref[...], preferred_element_type=jnp.float32) + b1_ref[...]
        # bf16 weights -> feed the MXU bf16 for the second pass (fast path); accumulation stays f32.
        out = jnp.dot(h.astype(h_dtype), w2_ref[...], preferred_element_type=jnp.float32)
        out = out + b2_ref[...]
        o_ref[...] = out.astype(o_ref.dtype)
    return kernel


def factored_linear(x, w1, b1, w2, b2, *, tb=None):
    """x: (B, d); w1: (d, e); b1: (e,)|(1,e); w2: (e, k); b2: (k,)|(1,k) -> (B, k).

    Weights are stored pre-transposed as (in_features, out_features) so the kernel computes
    (x @ W1 + b1) @ W2 + b2, matching PyTorch Linear (x @ W.T + b) semantics.
    """
    B, d = x.shape
    e = w1.shape[1]
    k = w2.shape[1]

    # Only the (tiny) weights/biases are padded: round the hidden dim e to a lane multiple so the
    # intermediate h is lane-dense.  Padding is inert (zero w1 cols + zero b1 -> zero h cols, which
    # hit zero w2 rows).  x and the output stay completely unpadded.
    # TODO(synk): if the first matmul becomes MXU-bound on v6e/v7x, round e up to 256 instead.
    e_p = _round_up(e, 128)
    w1_p = jnp.zeros((d, e_p), w1.dtype).at[:, :e].set(w1)
    b1_p = jnp.zeros((1, e_p), jnp.float32).at[:, :e].set(b1.reshape(1, e).astype(jnp.float32))
    w2_p = jnp.zeros((e_p, k), w2.dtype).at[:e, :].set(w2)
    b2_f = b2.reshape(1, k).astype(jnp.float32)

    isz = jnp.dtype(x.dtype).itemsize
    wsz = jnp.dtype(w1.dtype).itemsize
    d_lane = _round_up(d, 128)   # internal lane-padded layouts (VMEM accounting only)
    k_lane = _round_up(k, 128)
    d_sub = _round_up(d, 8)

    def vmem_need(t):
        return (
            2 * t * d_lane * isz                                   # x tiles (double-buffered)
            + 2 * t * k_lane * isz                                 # out tiles (double-buffered)
            + _WEIGHT_BUFS * (d_sub * e_p + e_p * k_lane) * wsz    # resident weights
            + _WEIGHT_BUFS * 8 * (e_p + k_lane) * 4                # biases: full 8-sublane tiles
            + t * e_p * 4                                          # hidden activation h (f32)
            + t * k_lane * 4                                       # f32 output temp before cast
        )

    # Generation-aware VMEM budget (~56 MiB on v7x, ~112 MiB on v5e/v6e).
    budget = (_vmem_capacity_bytes() * 7) // 8

    if tb is None:
        if B <= 8:
            tb = B                                      # one full-extent block
        else:
            # 512-row tiles sit near the HBM roofline; keep >= 2 grid steps so both v7x
            # TensorCores get work under dimension_semantics=("parallel",).
            tb = min(512, _round_up(pl.cdiv(B, 2), 8))
            while tb > 8 and vmem_need(tb) > budget:
                tb = max(8, _round_up(tb // 2, 8))
    else:
        tb = B if tb >= B else _round_up(tb, 8)

    grid = (pl.cdiv(B, tb),)
    need = vmem_need(tb)
    # Never cap below the computed requirement; floor at 16 MiB, ceiling at the per-gen budget.
    vmem_limit = max(min(max(need, 16 * 1024 * 1024), budget), need)

    cost = pl.CostEstimate(
        flops=2 * B * d * e_p + 2 * B * e_p * k,
        transcendentals=0,
        bytes_accessed=(
            x.size * isz
            + w1_p.size * wsz
            + w2_p.size * jnp.dtype(w2.dtype).itemsize
            + (b1_p.size + b2_f.size) * 4
            + B * k * isz
        ),
    )

    h_dtype = jnp.bfloat16 if jnp.dtype(w2.dtype) == jnp.dtype(jnp.bfloat16) else jnp.float32

    return pl.pallas_call(
        _make_kernel(h_dtype),
        out_shape=jax.ShapeDtypeStruct((B, k), x.dtype),
        grid_spec=pltpu.PrefetchScalarGridSpec(
            num_scalar_prefetch=0,
            grid=grid,
            in_specs=[
                pl.BlockSpec((tb, d), lambda i: (i, 0)),                    # x: pipelined batch
                pl.BlockSpec((d, e_p), lambda i: (0, 0), **_RESIDENT_KW),   # w1: VMEM-resident
                pl.BlockSpec((1, e_p), lambda i: (0, 0), **_RESIDENT_KW),   # b1
                pl.BlockSpec((e_p, k), lambda i: (0, 0), **_RESIDENT_KW),   # w2
                pl.BlockSpec((1, k), lambda i: (0, 0), **_RESIDENT_KW),     # b2
            ],
            out_specs=pl.BlockSpec((tb, k), lambda i: (i, 0)),
        ),
        compiler_params=pltpu.CompilerParams(
            dimension_semantics=("parallel",),   # batch axis shards across TensorCores (v7x)
            vmem_limit_bytes=int(vmem_limit),
        ),
        cost_estimate=cost,
    )(x, w1_p, b1_p, w2_p, b2_f)


if __name__ == "__main__":
    # Small shapes consistent with the module: d input features, e hidden, k = len(class_labels).
    B, d, e, k = 8, 32, 16, 10

    key = jax.random.PRNGKey(0)
    kx, kw1, kb1, kw2, kb2 = jax.random.split(key, 5)

    # Deterministic init mirroring torch.nn.Linear (uniform +/- 1/sqrt(fan_in)).
    bound1 = 1.0 / (d ** 0.5)
    bound2 = 1.0 / (e ** 0.5)
    x = jax.random.normal(kx, (B, d), dtype=jnp.float32)
    w1 = jax.random.uniform(kw1, (d, e), jnp.float32, -bound1, bound1)   # fc1.weight.T
    b1 = jax.random.uniform(kb1, (1, e), jnp.float32, -bound1, bound1)   # fc1.bias
    w2 = jax.random.uniform(kw2, (e, k), jnp.float32, -bound2, bound2)   # fc2.weight.T
    b2 = jax.random.uniform(kb2, (1, k), jnp.float32, -bound2, bound2)   # fc2.bias

    out = factored_linear(x, w1, b1, w2, b2)
    out = jax.block_until_ready(out)

    # Reference check against plain JAX (same math as the PyTorch forward).
    ref = (x @ w1 + b1) @ w2 + b2
    assert out.shape == (B, k)
    assert jnp.allclose(out, ref, atol=1e-5, rtol=1e-5)

    print("KERNEL_OK")
</pallas_src>

<mosaic_0001>
module attributes {stable_mosaic.version = 11 : i64} {
  func.func @kernel(%arg0: i32, %arg1: memref<8x32xf32, #tpu.memory_space<vmem>>, %arg2: memref<32x128xf32, #tpu.memory_space<vmem>>, %arg3: memref<1x128xf32, #tpu.memory_space<vmem>>, %arg4: memref<128x10xf32, #tpu.memory_space<vmem>>, %arg5: memref<1x10xf32, #tpu.memory_space<vmem>>, %arg6: memref<8x10xf32, #tpu.memory_space<vmem>>) attributes {dimension_semantics = [#tpu.dimension_semantics<parallel>], iteration_bounds = array<i64: 1>, scalar_prefetch = 0 : i64, scratch_operands = 0 : i64, tpu.core_type = #tpu.core_type<tc>, window_params = [{transform_indices = @transform_0, window_bounds = array<i64: 8, 32>}, {pipeline_mode = #tpu.pipeline_mode<synchronous>, transform_indices = @transform_1, window_bounds = array<i64: 32, 128>}, {pipeline_mode = #tpu.pipeline_mode<synchronous>, transform_indices = @transform_2, window_bounds = array<i64: 1, 128>}, {pipeline_mode = #tpu.pipeline_mode<synchronous>, transform_indices = @transform_3, window_bounds = array<i64: 128, 10>}, {pipeline_mode = #tpu.pipeline_mode<synchronous>, transform_indices = @transform_4, window_bounds = array<i64: 1, 10>}, {transform_indices = @transform_5, window_bounds = array<i64: 8, 10>}]} {
    %c0 = arith.constant 0 : index
    %c0_0 = arith.constant 0 : index
    %0 = vector.load %arg1[%c0, %c0_0] : memref<8x32xf32, #tpu.memory_space<vmem>>, vector<8x32xf32>
    %c0_1 = arith.constant 0 : index
    %c0_2 = arith.constant 0 : index
    %1 = vector.load %arg2[%c0_1, %c0_2] : memref<32x128xf32, #tpu.memory_space<vmem>>, vector<32x128xf32>
    %cst = arith.constant dense<0.000000e+00> : vector<8x128xf32>
    %2 = tpu.matmul %0, %1, %cst {dimension_numbers = #tpu.dot_dimension_numbers<[1], [0], [0], [1], [0, 0, 1, 1], [], []>} : vector<8x32xf32>, vector<32x128xf32>, vector<8x128xf32> -> vector<8x128xf32>
    %c0_3 = arith.constant 0 : index
    %c0_4 = arith.constant 0 : index
    %3 = vector.load %arg3[%c0_3, %c0_4] : memref<1x128xf32, #tpu.memory_space<vmem>>, vector<1x128xf32>
    %4 = vector.broadcast %3 : vector<1x128xf32> to vector<8x128xf32>
    %5 = arith.addf %2, %4 : vector<8x128xf32>
    %c0_5 = arith.constant 0 : index
    %c0_6 = arith.constant 0 : index
    %6 = vector.load %arg4[%c0_5, %c0_6] : memref<128x10xf32, #tpu.memory_space<vmem>>, vector<128x10xf32>
    %cst_7 = arith.constant dense<0.000000e+00> : vector<8x10xf32>
    %7 = tpu.matmul %5, %6, %cst_7 {dimension_numbers = #tpu.dot_dimension_numbers<[1], [0], [0], [1], [0, 0, 1, 1], [], []>} : vector<8x128xf32>, vector<128x10xf32>, vector<8x10xf32> -> vector<8x10xf32>
    %c0_8 = arith.constant 0 : index
    %c0_9 = arith.constant 0 : index
    %8 = vector.load %arg5[%c0_8, %c0_9] : memref<1x10xf32, #tpu.memory_space<vmem>>, vector<1x10xf32>
    %9 = vector.broadcast %8 : vector<1x10xf32> to vector<8x10xf32>
    %10 = arith.addf %7, %9 : vector<8x10xf32>
    %c0_10 = arith.constant 0 : index
    %c0_11 = arith.constant 0 : index
    %11 = vector.load %arg6[%c0_10, %c0_11] : memref<8x10xf32, #tpu.memory_space<vmem>>, vector<8x10xf32>
    tpu.vector_store %arg6[%c0_10, %c0_11], %10 {strides = array<i32>} : memref<8x10xf32, #tpu.memory_space<vmem>>, vector<8x10xf32>,
    return
  }
  func.func @transform_0(%arg0: i32) -> (i32, i32) {
    %c0_i32 = arith.constant 0 : i32
    %c0_i32_0 = arith.constant 0 : i32
    return %arg0, %c0_i32 : i32, i32
  }
  func.func @transform_1(%arg0: i32) -> (i32, i32) {
    %c0_i32 = arith.constant 0 : i32
    %c0_i32_0 = arith.constant 0 : i32
    %c0_i32_1 = arith.constant 0 : i32
    return %c0_i32, %c0_i32_0 : i32, i32
  }
  func.func @transform_2(%arg0: i32) -> (i32, i32) {
    %c0_i32 = arith.constant 0 : i32
    %c0_i32_0 = arith.constant 0 : i32
    %c0_i32_1 = arith.constant 0 : i32
    return %c0_i32, %c0_i32_0 : i32, i32
  }
  func.func @transform_3(%arg0: i32) -> (i32, i32) {
    %c0_i32 = arith.constant 0 : i32
    %c0_i32_0 = arith.constant 0 : i32
    %c0_i32_1 = arith.constant 0 : i32
    return %c0_i32, %c0_i32_0 : i32, i32
  }
  func.func @transform_4(%arg0: i32) -> (i32, i32) {
    %c0_i32 = arith.constant 0 : i32
    %c0_i32_0 = arith.constant 0 : i32
    %c0_i32_1 = arith.constant 0 : i32
    return %c0_i32, %c0_i32_0 : i32, i32
  }
  func.func @transform_5(%arg0: i32) -> (i32, i32) {
    %c0_i32 = arith.constant 0 : i32
    %c0_i32_0 = arith.constant 0 : i32
    return %arg0, %c0_i32 : i32, i32
  }
}

</mosaic_0001>

<bundles_post_ra>
// kernel: tpu_custom_call.1
= control target key start
LH: loop header
LB: loop body
LE: loop exit
PB: predicated region body
PF: predicated region fallthrough
CT: control target
= control target key end

     0   :  { %v345_v3 = vmov 0.0|0.0   ;;  %vm346_vm0 = vmmov 0   ;;  %v347_v6 = vmov 0.0   ;;  %s460_s0 = inlined_call_operand.vmem [shape: f32[8,32], index: 0, kind: input, shape index: {}]   ;;  %s461_s1 = inlined_call_operand.vmem [shape: f32[32,128], index: 1, kind: input, shape index: {}]   ;;  %s462_s2 = inlined_call_operand.vmem [shape: f32[1,128], index: 2, kind: input, shape index: {}]   ;;  %s463_s3 = inlined_call_operand.vmem [shape: f32[128,10], index: 3, kind: input, shape index: {}]   ;;  %s464_s4 = inlined_call_operand.vmem [shape: f32[1,10], index: 4, kind: input, shape index: {}]   ;;  %s465_s5 = inlined_call_operand.hbm [shape: f32[8,10], index: 5, kind: output, shape index: {}]  }
   0x1   :  { %v22_v0 = vld [vmem:[%s461_s1] sm:$0xff]  ;;  %v23_v1 = vld [vmem:[%s461_s1 + $0x8] sm:$0xff]  ;;  %v24_v2 = vld [vmem:[%s461_s1 + $0x10] sm:$0xff]  ;;  %287 = vmatprep.subr.bf16.mxu0 %v345_v3  ;;  %249 = vmatprep.mubr.msk.f32.mxu0 %vm346_vm0, %v347_v6 }
   0x2   :  { %v288_v4 = vpack.c.bf16 %v23_v1, %v22_v0  ;;  %v25_v5 = vld [vmem:[%s461_s1 + $0x18] sm:$0xff]  ;;  %v107_v7 = vld [vmem:[%s463_s3] sm:$0xff]  ;;  %293 = vmatprep.subr.bf16.mxu1 %v345_v3  ;;  %v108_v8 = vld [vmem:[%s463_s3 + $0x8] sm:$0xff]  ;;  %284 = vmatprep.mubr.msk.f32.mxu1 %vm346_vm0, %v347_v6 }
   0x3   :  { %v109_v9 = vld [vmem:[%s463_s3 + $0x10] sm:$0xff]  ;;  %v110_v10 = vld [vmem:[%s463_s3 + $0x18] sm:$0xff]  ;;  %v291_v11 = vpack.c.bf16 %v25_v5, %v24_v2  ;;  %v294_v12 = vpack.c.bf16 %v108_v8, %v107_v7  ;;  %v111_v14 = vld [vmem:[%s463_s3 + $0x20] sm:$0xff] }
   0x4   :  { %289 = vmatpush3.bf16.msra.mxu0 %v288_v4  ;;  %v297_v13 = vpack.c.bf16 %v110_v10, %v109_v9  ;;  %v112_v15 = vld [vmem:[%s463_s3 + $0x28] sm:$0xff] }
   0x5   :  { %290 = vmatprep.subr.bf16.mxu0 %v345_v3  ;;  %295 = vmatpush3.bf16.msra.mxu1 %v294_v12 }
   0x6   :  { %296 = vmatprep.subr.bf16.mxu1 %v345_v3 }
   0x7   :  { %10 = vsyncpa [#allocation3], 0  ;;  %v21_v16 = vld [vmem:[%s460_s0] sm:$0xff]  ;;  %vm33_vm1 = vcmask 261120   ;;  %v300_v17 = vpack.c.bf16 %v112_v15, %v111_v14  ;;  %v113_v18 = vld [vmem:[%s463_s3 + $0x30] sm:$0xff]  ;;  %s348_s11 = smov [#allocation2]  }
   0x8   :  { %292 = vmatpush3.bf16.msra.mxu0 %v291_v11  ;;  %v114_v19 = vld [vmem:[%s463_s3 + $0x38] sm:$0xff]  ;;  %v115_v21 = vld [vmem:[%s463_s3 + $0x40] sm:$0xff]  ;;  %v116_v22 = vld [vmem:[%s463_s3 + $0x48] sm:$0xff]  ;;  %s208_s12 = sshll.u32 %s348_s11, 4  ;;  %vm200_vm2 = vcmask 80896   ;;  %s209_s12 = int_to_ptr.vmem [resolvable:$true] %s208_s12 }
   0x9   :  { %298 = vmatpush3.bf16.msra.mxu1 %v297_v13  ;;  %v303_v20 = vpack.c.bf16 %v114_v19, %v113_v18  ;;  %v306_v23 = vpack.c.bf16 %v116_v22, %v115_v21  ;;  %v117_v24 = vld [vmem:[%s463_s3 + $0x50] sm:$0xff]  ;;  %v118_v25 = vld [vmem:[%s463_s3 + $0x58] sm:$0xff]  ;;  %v119_v27 = vld [vmem:[%s463_s3 + $0x60] sm:$0xff]  ;;  %p326_p1 = scmp.lt.s32.totalorder %s209_s12, %s209_s12 }
   0xa   :  { %299 = vmatprep.subr.bf16.mxu1 %v345_v3  ;;  %v309_v26 = vpack.c.bf16 %v118_v25, %v117_v24  ;;  %v120_v28 = vld [vmem:[%s463_s3 + $0x68] sm:$0xff]  ;;  %v121_v30 = vld [vmem:[%s463_s3 + $0x70] sm:$0xff]  ;;  %v122_v31 = vld [vmem:[%s463_s3 + $0x78] sm:$0xff]  ;;  %s321_s3 = scalar_lea.vmem %s209_s12, 128 }
   0xb   :  { %250 = vmatmul.mubr.msk.f32.vlgmr.msra.gmra.mrb[0].mxu0 %vm33_vm1, %v21_v16  ;;  %v312_v29 = vpack.c.bf16 %v120_v28, %v119_v27  ;;  %v315_v32 = vpack.c.bf16 %v122_v31, %v121_v30  ;;  %v216_v33 = vld [vmem:[%s462_s2] ss:$0 sm:$0xff]  ;;  %p322_p0 = scmp.ne.s32.totalorder %s209_s12, %s321_s3  ;;  %p327_p2 = scmp.lt.s32.totalorder %s321_s3, %s321_s3 }
   0xc   :  { %v218_v37 = vld [vmem:[%s464_s4] ss:$0 sm:$0xff] }
   0xd   :  { %301 = vmatpush3.bf16.msra.mxu1 %v300_v17  ;;  %p328_p3 = por %p327_p2, %p326_p1 }
   0xe   :  { %302 = vmatprep.subr.bf16.mxu1 %v345_v3 }
   0xf   :  { %p329_p4 = pnand %p328_p3, %p322_p0 }
  0x11   :  { %304 = vmatpush3.bf16.msra.mxu1 %v303_v20 }
  0x12   :  { %305 = vmatprep.subr.bf16.mxu1 %v345_v3 }
  0x15   :  { %307 = vmatpush3.bf16.msra.mxu1 %v306_v23 }
  0x16   :  { %308 = vmatprep.subr.bf16.mxu1 %v345_v3 }
  0x19   :  { %310 = vmatpush3.bf16.msra.mxu1 %v309_v26 }
  0x1a   :  { %311 = vmatprep.subr.bf16.mxu1 %v345_v3 }
  0x1d   :  { %313 = vmatpush3.bf16.msra.mxu1 %v312_v29 }
  0x1e   :  { %314 = vmatprep.subr.bf16.mxu1 %v345_v3 }
  0x21   :  { %316 = vmatpush3.bf16.msra.mxu1 %v315_v32 }
  0xde   :  { %v103_v34 = vpop.f32.mrb[0].mxu0 }
  0xdf   :  { %v104_v35 = vadd.f32 %v216_v33, %v103_v34  ;;  %v251_v36 = vpop.f32.mrb[1].mxu0 }
  0xe1   :  { %285 = vmatmul.mubr.f32.vlgmr.msra.gmra.mrb[0].mxu1 %v104_v35 }
 0x1b4   :  { %v196_v38 = vpop.f32.mrb[0].mxu1 }
 0x1b5   :  { %v197_v39 = vadd.f32 %v218_v37, %v196_v38  ;;  %v286_v40 = vpop.f32.mrb[1].mxu1 }
 0x1b7   :  { %201 = vst.msk [vmem:[#allocation2] sm:$0xff] %vm200_vm2, %v197_v39 }
 0x1b8   :  { %332 = shalt.err (!%p329_p4)
}
 0x1b9   :  { %s333_s14 = scalar_lea.hbm %s465_s5, 128 }
 0x1ba   :  { %p334_p5 = scmp.ne.s32.totalorder %s465_s5, %s333_s14  ;;  %p337_p6 = scmp.lt.u32.totalorder %s333_s14, %s465_s5 }
 0x1bc   :  { %p339_p7 = pnand %p337_p6, %p334_p5 }
 0x1be   :  { %342 = shalt.err (!%p339_p7)
}
 0x1bf   :  { %211 = dma.vmem_to_hbm [thread:$0]  %s209_s12, 128, %s465_s5, [#allocation3]  }
 0x1c0   :  { %343 = dma.done.wait [#allocation3], 128  }
 0x1c1   :  { %344 = vsyncadd [#allocation3], 4294967168 }
 0x1c2   :  { %215 = vsyncpa [#allocation3], 1 }

</bundles_post_ra>
